<compile_context>
chip_gen: v7x
topology: tpu7x:2x2x1
jax: 0.10.0
libtpu: 0.0.40
codegen_flags: <defaults>
</compile_context>

<pallas_src>
import jax
import jax.numpy as jnp
from jax.experimental import pallas as pl
from jax.experimental.pallas import tpu as pltpu


IN_FEATURES = 4
OUT_FEATURES = 3
PACK = 32                          # rows packed per 128-lane row (32 * 4 = 128)
PACKED_IN = PACK * IN_FEATURES     # 128 input lanes per packed row
PACKED_OUT = PACK * OUT_FEATURES   # 96 output lanes per packed row
SUBLANE = 16                       # block sublane alignment (covers bf16 packing)
DEFAULT_TILE_ROWS = 8192           # packed rows per grid step
VMEM_LIMIT_BYTES = 48 << 20        # explicit scoped-VMEM budget (safe on v5e/v6e/v7x)
SMALL_M_FAST_PATH = 4096           # below this many rows, plain XLA matmul wins


def _decoder_kernel(x_ref, w_ref, b_ref, o_ref):
    # x_ref: [T, 128]  packed input rows            (VMEM, streamed per tile)
    # w_ref: [128, 96] block-diagonal kron(I32, W^T) (VMEM, resident)
    # b_ref: [1, 96]   bias tiled 32x, f32           (VMEM, resident)
    # o_ref: [T, 96]   packed output rows
    acc = jnp.dot(x_ref[...], w_ref[...], preferred_element_type=jnp.float32)
    o_ref[...] = (acc + b_ref[...]).astype(o_ref.dtype)


def _round_up(x, m):
    return (x + m - 1) // m * m


def _choose_tile(packed_rows, tile_rows):
    """Pick a sublane-aligned row tile giving >= ~4 (preferably even) steps."""
    tile_rows = max(SUBLANE, tile_rows // SUBLANE * SUBLANE)
    tile = min(tile_rows,
               max(SUBLANE, _round_up(pl.cdiv(packed_rows, 4), SUBLANE)))
    grid = pl.cdiv(packed_rows, tile)
    # Prefer an even step count so v7x's two TensorCores split the axis evenly.
    if grid > 1 and grid % 2 == 1:
        tile2 = max(SUBLANE, _round_up(pl.cdiv(packed_rows, grid + 1), SUBLANE))
        grid2 = pl.cdiv(packed_rows, tile2)
        if grid2 % 2 == 0:
            tile, grid = tile2, grid2
    return tile, grid


def decoder_forward(x, weight, bias, *,
                    tile_rows=DEFAULT_TILE_ROWS,
                    stream_dtype=None,
                    small_m_fast_path=SMALL_M_FAST_PATH):
    """Applies y = x @ weight.T + bias along the last axis of x.

    x            : [..., 4]
    weight       : [3, 4]   (PyTorch Linear convention)
    bias         : [3]
    stream_dtype : dtype streamed through the kernel (None -> x.dtype).  Pass
                   jnp.bfloat16 only when x is already bf16 or its producer can
                   fuse the cast; the output is emitted in this dtype.
    returns      : [..., 3]
    """
    orig_shape = x.shape
    assert orig_shape[-1] == IN_FEATURES
    assert weight.shape == (OUT_FEATURES, IN_FEATURES)
    assert bias.shape == (OUT_FEATURES,)

    m = 1
    for d in orig_shape[:-1]:
        m *= d

    compute_dtype = jnp.dtype(stream_dtype) if stream_dtype is not None \
        else jnp.dtype(x.dtype)
    out_dtype = compute_dtype

    x2d = x.reshape(m, IN_FEATURES)

    # Fast path: tiny M -> the kron/tile construction + pallas_call fixed
    # overhead dominate; a plain fused XLA matmul is faster.
    if m <= small_m_fast_path:
        y = jnp.dot(x2d.astype(compute_dtype), weight.astype(compute_dtype).T,
                    preferred_element_type=jnp.float32)
        y = (y + bias.astype(jnp.float32)).astype(out_dtype)
        return y.reshape(*orig_shape[:-1], OUT_FEATURES)

    if compute_dtype != x2d.dtype:
        # See header note: this cast is an extra HBM pass unless fused upstream.
        x2d = x2d.astype(compute_dtype)

    # Pad only up to the 32-row pack (<= 31 junk rows; padded rows evaluate to
    # the bias vector and are sliced off below).  No full-tile padding.
    packed_rows = pl.cdiv(m, PACK)
    padded_m = packed_rows * PACK
    if padded_m != m:
        x2d = jnp.pad(x2d, ((0, padded_m - m), (0, 0)))

    # Free (contiguous) repack to lane-dense form.
    x_packed = x2d.reshape(packed_rows, PACKED_IN)          # [ceil(M/32), 128]

    # Block-diagonal weight + tiled bias, built once in the wrapper (tiny).
    w_blk = jnp.kron(jnp.eye(PACK, dtype=jnp.float32),
                     weight.astype(jnp.float32).T).astype(compute_dtype)  # [128, 96]
    b_tiled = jnp.tile(bias.astype(jnp.float32), PACK).reshape(1, PACKED_OUT)

    tile, grid_m = _choose_tile(packed_rows, tile_rows)

    in_bytes = jnp.dtype(compute_dtype).itemsize
    out_bytes = jnp.dtype(out_dtype).itemsize
    cost = pl.CostEstimate(
        flops=2 * packed_rows * PACKED_IN * PACKED_OUT,
        transcendentals=0,
        bytes_accessed=(packed_rows * PACKED_IN * in_bytes
                        + packed_rows * PACKED_OUT * out_bytes
                        + PACKED_IN * PACKED_OUT * in_bytes
                        + PACKED_OUT * 4),
    )

    out_packed = pl.pallas_call(
        _decoder_kernel,
        out_shape=jax.ShapeDtypeStruct((packed_rows, PACKED_OUT), out_dtype),
        grid=(grid_m,),
        in_specs=[
            pl.BlockSpec((tile, PACKED_IN), lambda i: (i, 0)),         # streamed
            pl.BlockSpec((PACKED_IN, PACKED_OUT), lambda i: (0, 0)),   # resident
            pl.BlockSpec((1, PACKED_OUT), lambda i: (0, 0)),           # resident
        ],
        out_specs=pl.BlockSpec((tile, PACKED_OUT), lambda i: (i, 0)),
        compiler_params=pltpu.CompilerParams(
            dimension_semantics=("parallel",),
            vmem_limit_bytes=VMEM_LIMIT_BYTES),
        cost_estimate=cost,
    )(x_packed, w_blk, b_tiled)

    # Unpack, drop padded rows, restore leading dims.  (Rows are independent;
    # the partial last block's masked/garbage rows never survive this slice.)
    out2d = out_packed.reshape(padded_m, OUT_FEATURES)[:m]
    return out2d.reshape(*orig_shape[:-1], OUT_FEATURES)


def init_decoder_params(key):
    """Deterministic synthetic init matching nn.Linear(4, 3) shapes.

    PyTorch default: U(-1/sqrt(fan_in), 1/sqrt(fan_in)) for both W and b.
    """
    kw, kb = jax.random.split(key)
    bound = 1.0 / jnp.sqrt(jnp.float32(IN_FEATURES))
    weight = jax.random.uniform(
        kw, (OUT_FEATURES, IN_FEATURES), jnp.float32, -bound, bound)
    bias = jax.random.uniform(
        kb, (OUT_FEATURES,), jnp.float32, -bound, bound)
    return weight, bias


if __name__ == "__main__":
    key = jax.random.PRNGKey(0)
    k_param, k_x1, k_x2 = jax.random.split(key, 3)

    weight, bias = init_decoder_params(k_param)

    # Case 1: channels-last latent "image" [batch=2, H=16, W=16, C_in=4];
    # Linear acts on the last axis (M = 512).  Force the kernel path.
    x1 = jax.random.normal(k_x1, (2, 16, 16, IN_FEATURES), jnp.float32)
    y1 = jax.block_until_ready(
        decoder_forward(x1, weight, bias, small_m_fast_path=0))
    y1_ref = jnp.einsum("...i,oi->...o", x1, weight) + bias
    assert y1.shape == (2, 16, 16, OUT_FEATURES)
    assert jnp.allclose(y1, y1_ref, atol=1e-5, rtol=1e-5)

    # Case 2: ragged M (not a multiple of 32) -> <=31-row pad + masked
    # partial block path.
    x2 = jax.random.normal(k_x2, (5, 7, IN_FEATURES), jnp.float32)
    y2 = jax.block_until_ready(
        decoder_forward(x2, weight, bias, small_m_fast_path=0))
    y2_ref = jnp.einsum("...i,oi->...o", x2, weight) + bias
    assert y2.shape == (5, 7, OUT_FEATURES)
    assert jnp.allclose(y2, y2_ref, atol=1e-5, rtol=1e-5)

    # Case 3: opt-in bf16 streaming path (f32 MXU accumulation); relaxed tol.
    y3 = jax.block_until_ready(
        decoder_forward(x1, weight, bias, stream_dtype=jnp.bfloat16,
                        small_m_fast_path=0))
    assert y3.dtype == jnp.bfloat16
    assert jnp.allclose(y3.astype(jnp.float32), y1_ref, atol=5e-2, rtol=5e-2)

    # Case 4: default small-M fast path (bypasses pallas_call).
    y4 = jax.block_until_ready(decoder_forward(x1, weight, bias))
    assert jnp.allclose(y4, y1_ref, atol=1e-5, rtol=1e-5)

    print("KERNEL_OK")
</pallas_src>

<mosaic_0001>
module attributes {stable_mosaic.version = 11 : i64} {
  func.func @_decoder_kernel(%arg0: i32, %arg1: memref<16x128xf32, #tpu.memory_space<vmem>>, %arg2: memref<128x96xf32, #tpu.memory_space<vmem>>, %arg3: memref<1x96xf32, #tpu.memory_space<vmem>>, %arg4: memref<16x96xf32, #tpu.memory_space<vmem>>) attributes {dimension_semantics = [#tpu.dimension_semantics<parallel>], iteration_bounds = array<i64: 1>, scalar_prefetch = 0 : i64, scratch_operands = 0 : i64, tpu.core_type = #tpu.core_type<tc>, window_params = [{transform_indices = @transform_0, window_bounds = array<i64: 16, 128>}, {pipeline_mode = #tpu.pipeline_mode<synchronous>, transform_indices = @transform_1, window_bounds = array<i64: 128, 96>}, {pipeline_mode = #tpu.pipeline_mode<synchronous>, transform_indices = @transform_2, window_bounds = array<i64: 1, 96>}, {transform_indices = @transform_3, window_bounds = array<i64: 16, 96>}]} {
    %c0 = arith.constant 0 : index
    %c0_0 = arith.constant 0 : index
    %0 = vector.load %arg1[%c0, %c0_0] : memref<16x128xf32, #tpu.memory_space<vmem>>, vector<16x128xf32>
    %c0_1 = arith.constant 0 : index
    %c0_2 = arith.constant 0 : index
    %1 = vector.load %arg2[%c0_1, %c0_2] : memref<128x96xf32, #tpu.memory_space<vmem>>, vector<128x96xf32>
    %cst = arith.constant dense<0.000000e+00> : vector<16x96xf32>
    %2 = tpu.matmul %0, %1, %cst {dimension_numbers = #tpu.dot_dimension_numbers<[1], [0], [0], [1], [0, 0, 1, 1], [], []>} : vector<16x128xf32>, vector<128x96xf32>, vector<16x96xf32> -> vector<16x96xf32>
    %c0_3 = arith.constant 0 : index
    %c0_4 = arith.constant 0 : index
    %3 = vector.load %arg3[%c0_3, %c0_4] : memref<1x96xf32, #tpu.memory_space<vmem>>, vector<1x96xf32>
    %4 = vector.broadcast %3 : vector<1x96xf32> to vector<16x96xf32>
    %5 = arith.addf %2, %4 : vector<16x96xf32>
    %c0_5 = arith.constant 0 : index
    %c0_6 = arith.constant 0 : index
    %6 = vector.load %arg4[%c0_5, %c0_6] : memref<16x96xf32, #tpu.memory_space<vmem>>, vector<16x96xf32>
    tpu.vector_store %arg4[%c0_5, %c0_6], %5 {strides = array<i32>} : memref<16x96xf32, #tpu.memory_space<vmem>>, vector<16x96xf32>,
    return
  }
  func.func @transform_0(%arg0: i32) -> (i32, i32) {
    %c0_i32 = arith.constant 0 : i32
    %c0_i32_0 = arith.constant 0 : i32
    return %arg0, %c0_i32 : i32, i32
  }
  func.func @transform_1(%arg0: i32) -> (i32, i32) {
    %c0_i32 = arith.constant 0 : i32
    %c0_i32_0 = arith.constant 0 : i32
    %c0_i32_1 = arith.constant 0 : i32
    return %c0_i32, %c0_i32_0 : i32, i32
  }
  func.func @transform_2(%arg0: i32) -> (i32, i32) {
    %c0_i32 = arith.constant 0 : i32
    %c0_i32_0 = arith.constant 0 : i32
    %c0_i32_1 = arith.constant 0 : i32
    return %c0_i32, %c0_i32_0 : i32, i32
  }
  func.func @transform_3(%arg0: i32) -> (i32, i32) {
    %c0_i32 = arith.constant 0 : i32
    %c0_i32_0 = arith.constant 0 : i32
    return %arg0, %c0_i32 : i32, i32
  }
}

</mosaic_0001>

<bundles_post_ra>
// kernel: tpu_custom_call.1
= control target key start
LH: loop header
LB: loop body
LE: loop exit
PB: predicated region body
PF: predicated region fallthrough
CT: control target
= control target key end

     0   :  { %s339_s0 = inlined_call_operand.vmem [shape: f32[16,128], index: 0, kind: input, shape index: {}]   ;;  %s340_s1 = inlined_call_operand.vmem [shape: f32[128,96], index: 1, kind: input, shape index: {}]   ;;  %s341_s2 = inlined_call_operand.vmem [shape: f32[1,96], index: 2, kind: input, shape index: {}]   ;;  %s342_s3 = inlined_call_operand.hbm [shape: f32[16,96], index: 3, kind: output, shape index: {}]  }
   0x1   :  { %v17_v0 = vld [vmem:[%s340_s1] sm:$0xff]  ;;  %v18_v1 = vld [vmem:[%s340_s1 + $0x8] sm:$0xff]  ;;  %v19_v2 = vld [vmem:[%s340_s1 + $0x10] sm:$0xff] }
   0x2   :  { %v188_v3 = vpack.c.bf16 %v18_v1, %v17_v0  ;;  %v20_v4 = vld [vmem:[%s340_s1 + $0x18] sm:$0xff]  ;;  %v21_v6 = vld [vmem:[%s340_s1 + $0x20] sm:$0xff]  ;;  %v22_v7 = vld [vmem:[%s340_s1 + $0x28] sm:$0xff] }
   0x3   :  { %v192_v5 = vpack.c.bf16 %v20_v4, %v19_v2  ;;  %v196_v8 = vpack.c.bf16 %v22_v7, %v21_v6  ;;  %v15_v9 = vld [vmem:[%s339_s0] sm:$0xff]  ;;  %v23_v10 = vld [vmem:[%s340_s1 + $0x30] sm:$0xff]  ;;  %v24_v11 = vld [vmem:[%s340_s1 + $0x38] sm:$0xff] }
   0x4   :  { %189 = vmatprep.subr.bf16.mxu0 %v188_v3  ;;  %185 = vmatprep.mubr.f32.mxu0 %v15_v9 }
   0x5   :  { %191 = vmatpush3.bf16.msra.mxu0 %v188_v3 }
   0x6   :  { %193 = vmatprep.subr.bf16.mxu0 %v192_v5 }
   0x7   :  { %8 = vsyncpa [#allocation3], 0  ;;  %v200_v12 = vpack.c.bf16 %v24_v11, %v23_v10  ;;  %v25_v13 = vld [vmem:[%s340_s1 + $0x40] sm:$0xff]  ;;  %v26_v14 = vld [vmem:[%s340_s1 + $0x48] sm:$0xff]  ;;  %s247_s23 = smov [#allocation2]   ;;  %vm115_vm0 = vcmask 785408  }
   0x8   :  { %v204_v15 = vpack.c.bf16 %v26_v14, %v25_v13  ;;  %v27_v16 = vld [vmem:[%s340_s1 + $0x50] sm:$0xff]  ;;  %v28_v17 = vld [vmem:[%s340_s1 + $0x58] sm:$0xff]  ;;  %v29_v19 = vld [vmem:[%s340_s1 + $0x60] sm:$0xff]  ;;  %s123_s24 = sshll.u32 %s247_s23, 4  ;;  %s124_s24 = int_to_ptr.vmem [resolvable:$true] %s123_s24 }
   0x9   :  { %195 = vmatpush3.bf16.msra.mxu0 %v192_v5  ;;  %v208_v18 = vpack.c.bf16 %v28_v17, %v27_v16  ;;  %v30_v20 = vld [vmem:[%s340_s1 + $0x68] sm:$0xff]  ;;  %v31_v22 = vld [vmem:[%s340_s1 + $0x70] sm:$0xff]  ;;  %v32_v23 = vld [vmem:[%s340_s1 + $0x78] sm:$0xff]  ;;  %s223_s1 = scalar_lea.vmem %s124_s24, 256  ;;  %p228_p1 = scmp.lt.s32.totalorder %s124_s24, %s124_s24 }
   0xa   :  { %197 = vmatprep.subr.bf16.mxu0 %v196_v8  ;;  %v212_v21 = vpack.c.bf16 %v30_v20, %v29_v19  ;;  %v216_v24 = vpack.c.bf16 %v32_v23, %v31_v22  ;;  %v16_v25 = vld [vmem:[%s339_s0 + $0x8] sm:$0xff]  ;;  %v134_v26 = vld [vmem:[%s341_s2] ss:$0 sm:$0xff]  ;;  %p224_p0 = scmp.ne.s32.totalorder %s124_s24, %s223_s1  ;;  %p229_p2 = scmp.lt.s32.totalorder %s223_s1, %s223_s1 }
   0xc   :  { %p230_p3 = por %p229_p2, %p228_p1 }
   0xd   :  { %199 = vmatpush3.bf16.msra.mxu0 %v196_v8 }
   0xe   :  { %201 = vmatprep.subr.bf16.mxu0 %v200_v12  ;;  %p231_p4 = pnand %p230_p3, %p224_p0 }
  0x11   :  { %203 = vmatpush3.bf16.msra.mxu0 %v200_v12 }
  0x12   :  { %205 = vmatprep.subr.bf16.mxu0 %v204_v15 }
  0x15   :  { %207 = vmatpush3.bf16.msra.mxu0 %v204_v15 }
  0x16   :  { %209 = vmatprep.subr.bf16.mxu0 %v208_v18 }
  0x19   :  { %211 = vmatpush3.bf16.msra.mxu0 %v208_v18 }
  0x1a   :  { %213 = vmatprep.subr.bf16.mxu0 %v212_v21 }
  0x1d   :  { %215 = vmatpush3.bf16.msra.mxu0 %v212_v21 }
  0x1e   :  { %217 = vmatprep.subr.bf16.mxu0 %v216_v24 }
  0x21   :  { %219 = vmatpush3.bf16.msra.mxu0 %v216_v24 }
  0x24   :  { %186 = vmatmul.mubr.f32.vlgmr.msra.gmra.mrb[0].mxu0 %v16_v25 }
  0xf7   :  { %v187_v27 = vpop.f32.mrb[0].mxu0 }
  0xf8   :  { %v112_v28 = vadd.f32 %v187_v27, %v134_v26  ;;  %v106_v29 = vpop.f32.mrb[1].mxu0 }
  0xf9   :  { %v107_v30 = vadd.f32 %v134_v26, %v106_v29 }
  0xfa   :  { %117 = vst.msk [vmem:[#allocation2 + $0x8] sm:$0xff] %vm115_vm0, %v112_v28 }
  0xfb   :  { %116 = vst.msk [vmem:[#allocation2] sm:$0xff] %vm115_vm0, %v107_v30 }
  0xfc   :  { %234 = shalt.err (!%p231_p4)
}
  0xfd   :  { %s235_s2 = scalar_lea.hbm %s342_s3, 256 }
  0xfe   :  { %p236_p5 = scmp.ne.s32.totalorder %s342_s3, %s235_s2  ;;  %p239_p6 = scmp.lt.u32.totalorder %s235_s2, %s342_s3 }
 0x100   :  { %p241_p7 = pnand %p239_p6, %p236_p5 }
 0x102   :  { %244 = shalt.err (!%p241_p7)
}
 0x103   :  { %s248_s30 = smov 128   ;;  %s249_s4 = smov 8  }
 0x104   :  { %129 = dma.vmem_to_hbm [thread:$0]  %s124_s24, 256, %s342_s3, [#allocation3], %s248_s30, %s248_s30, %s249_s4  }
 0x105   :  { %245 = dma.done.wait [#allocation3], 256  }
 0x106   :  { %246 = vsyncadd [#allocation3], 4294967040 }
 0x107   :  { %133 = vsyncpa [#allocation3], 1 }

</bundles_post_ra>
